<compile_context>
chip_gen: v5e
topology: v5e:2x2
jax: 0.10.0
libtpu: 0.0.40
codegen_flags: <defaults>
</compile_context>

<pallas_src>
import functools

import numpy as np
import jax
import jax.numpy as jnp
from jax import lax
from jax.experimental import pallas as pl
from jax.experimental.pallas import tpu as pltpu


# ---------------------------------------------------------------------------
# Parameter construction (deterministic, synthetic)
# ---------------------------------------------------------------------------
def _conv_params(key, cout, cin, k, scale=0.1):
    kw, kb = jax.random.split(key)
    return {
        "w": jax.random.normal(kw, (cout, cin, k, k), jnp.float32) * scale,
        "b": jax.random.normal(kb, (cout,), jnp.float32) * scale,
    }


def init_params(key, cfg):
    in_channels = cfg["in_channels"]
    nc = cfg["num_channels"]
    rev_levels = list(reversed(range(cfg["bottom_level"], cfg["top_level"])))
    keys = iter(jax.random.split(key, 64))
    p = {}
    # SPPM (context aggregation on top level)
    p["sppm_pool"] = [
        _conv_params(next(keys), nc, in_channels[cfg["top_level"]], 1)
        for _ in cfg["pool_sizes"]
    ]
    p["sppm_out"] = _conv_params(next(keys), nc, nc, 3)
    p["sppm_shortcut"] = _conv_params(next(keys), nc, in_channels[cfg["top_level"]], 1)
    # FPN-style decoder
    p["lateral"] = [_conv_params(next(keys), nc, in_channels[lvl], 3) for lvl in rev_levels]
    p["upscale"] = [_conv_params(next(keys), nc, nc, 3) for _ in rev_levels]
    p["uafm_att"] = [_conv_params(next(keys), 1, 4, 3) for _ in rev_levels]
    p["uafm_out"] = [_conv_params(next(keys), nc, nc, 3) for _ in rev_levels]
    # stem
    p["stem"] = [_conv_params(next(keys), nc, nc, 3) for _ in range(cfg["num_layers"])]
    # heads
    p["class_head"] = _conv_params(next(keys), cfg["num_tokens"] + 1, nc, 1)
    p["index_head"] = _conv_params(next(keys), cfg["max_sequence_length"], nc, 1)
    return p


# ---------------------------------------------------------------------------
# Backbone / neck (plain JAX glue; NCHW like PyTorch)
# ---------------------------------------------------------------------------
# TODO(synk): BatchNorm layers inside ConvNormAct are initialized to identity
# (eval mode, gamma=1, beta=0, mean=0, var=1) and therefore omitted; SPPM /
# UAFM / SimpleUpscaler are implemented in their standard PP-LiteSeg form.
def conv2d(x, pw):
    y = lax.conv_general_dilated(
        x, pw["w"], (1, 1), "SAME", dimension_numbers=("NCHW", "OIHW", "NCHW")
    )
    return y + pw["b"][None, :, None, None]


def conv_relu(x, pw):
    return jax.nn.relu(conv2d(x, pw))


def sppm(x, params, pool_sizes):
    n, c, h, w = x.shape
    acc = None
    for s, pw in zip(pool_sizes, params["sppm_pool"]):
        pooled = x.reshape(n, c, s, h // s, s, w // s).mean(axis=(3, 5))
        branch = conv_relu(pooled, pw)  # 1x1 conv
        up = jnp.repeat(jnp.repeat(branch, h // s, axis=2), w // s, axis=3)
        acc = up if acc is None else acc + up
    out = conv_relu(acc, params["sppm_out"])  # 3x3 conv
    shortcut = conv_relu(x, params["sppm_shortcut"])  # 1x1 conv
    return out + shortcut


def uafm(x_high, x_low, p_att, p_out):
    stats = jnp.concatenate(
        [
            x_high.mean(axis=1, keepdims=True),
            x_high.max(axis=1, keepdims=True),
            x_low.mean(axis=1, keepdims=True),
            x_low.max(axis=1, keepdims=True),
        ],
        axis=1,
    )
    alpha = jax.nn.sigmoid(conv2d(stats, p_att))
    fused = x_high * alpha + x_low * (1.0 - alpha)
    return conv_relu(fused, p_out)


def get_features(inputs, params, cfg):
    x = sppm(inputs[cfg["top_level"]], params, cfg["pool_sizes"])
    rev_levels = list(reversed(range(cfg["bottom_level"], cfg["top_level"])))
    for i, lvl in enumerate(rev_levels):
        lat = conv_relu(inputs[lvl], params["lateral"][i])
        up = jnp.repeat(jnp.repeat(x, 2, axis=2), 2, axis=3)  # nearest x2
        up = conv_relu(up, params["upscale"][i])
        x = uafm(lat, up, params["uafm_att"][i], params["uafm_out"][i])
    for pw in params["stem"]:
        x = conv_relu(x, pw)
    return x  # (N, num_channels, H3, W3)


# ---------------------------------------------------------------------------
# Pallas head kernel: fused class+index 1x1 conv (one bf16 MXU matmul / sample)
# + spatial-mean class*index reduction (second matmul) + logit-norm + softmax
# + max/argmax + padding mask, for the whole batch in one invocation.
# ---------------------------------------------------------------------------
def head_kernel(x_ref, w_ref, b_ref, scores_ref, tokens_ref, logits_scr,
                *, num_tokens, seq, scale):
    k1 = num_tokens + 1
    n_b, _, hw = x_ref.shape
    inv_hw = 1.0 / hw
    out_lanes = scores_ref.shape[1]

    w = w_ref[...]            # (K1+L, C)  bf16, fused class+index weights
    b = b_ref[...]            # (K1+L, 1)  f32

    # Zero the lane-dense staging buffer (unused lanes stay deterministic 0).
    logits_scr[...] = jnp.zeros_like(logits_scr)

    # Per-sample matmuls; (K1, L) logits are packed side by side along lanes.
    for i in range(n_b):
        xb = x_ref[i]                                                  # (C, HW) bf16
        maps = jnp.dot(w, xb, preferred_element_type=jnp.float32) + b  # (K1+L, HW) f32
        cls = maps[:k1]                                                # (K1, HW)
        idx = jax.nn.sigmoid(maps[k1:])                                # (L, HW)
        logits_i = lax.dot_general(
            cls.astype(jnp.bfloat16), idx.astype(jnp.bfloat16),
            (((1,), (1,)), ((), ())),
            preferred_element_type=jnp.float32,
        ) * inv_hw                                                     # (K1, L)
        logits_scr[:, i * seq:(i + 1) * seq] = logits_i

    logits = logits_scr[...]                                           # (K1, 128)

    # F.normalize(dim=class) * scale   (rsqrt -> EUP)
    ssq = jnp.sum(logits * logits, axis=0, keepdims=True)
    logits = logits * (lax.rsqrt(jnp.maximum(ssq, 1e-24)) * scale)

    # softmax over classes; EUP approx reciprocal (per-column scale preserves argmax)
    m = jnp.max(logits, axis=0, keepdims=True)
    e = jnp.exp(logits - m)
    probs = e * pl.reciprocal(jnp.sum(e, axis=0, keepdims=True), approx=True)

    # max / first-argmax over classes (matches torch.max tie-breaking)
    max_p = jnp.max(probs, axis=0, keepdims=True)                      # (1, 128)
    k_ids = lax.broadcasted_iota(jnp.int32, probs.shape, 0)
    tok = jnp.min(jnp.where(probs == max_p, k_ids, k1), axis=0, keepdims=True)

    # padding-token mask + invalid-lane mask; two full-lane (unmasked) stores
    lane = lax.broadcasted_iota(jnp.int32, (1, out_lanes), 1)
    keep = (lane < n_b * seq) & (tok != num_tokens)
    scores_ref[...] = jnp.where(keep, max_p, 0.0)
    tokens_ref[...] = jnp.where(keep, tok, 0)


def scene_text_recognition_head(features_nchw, params, cfg):
    n, c, h, w = features_nchw.shape
    hw = h * w
    k1 = cfg["num_tokens"] + 1
    seq = cfg["max_sequence_length"]
    kt = k1 + seq
    out_lanes = max(128, ((n * seq + 127) // 128) * 128)

    # (N, C, H, W) -> (N, C, HW): pure reshape (no transpose), bf16 for the MXU/DMA.
    x = features_nchw.reshape(n, c, hw).astype(jnp.bfloat16)

    # Fuse class + index heads into one weight / bias.
    w_all = jnp.concatenate(
        [params["class_head"]["w"][:, :, 0, 0], params["index_head"]["w"][:, :, 0, 0]],
        axis=0,
    ).astype(jnp.bfloat16)                                             # (K1+L, C)
    b_all = jnp.concatenate(
        [params["class_head"]["b"], params["index_head"]["b"]], axis=0
    ).reshape(kt, 1)                                                   # (K1+L, 1) f32

    kernel = functools.partial(
        head_kernel, num_tokens=cfg["num_tokens"], seq=seq, scale=cfg["logitnorm_scale"]
    )
    scores, tokens = pl.pallas_call(
        kernel,
        out_shape=(
            jax.ShapeDtypeStruct((1, out_lanes), jnp.float32),
            jax.ShapeDtypeStruct((1, out_lanes), jnp.int32),
        ),
        grid_spec=pltpu.PrefetchScalarGridSpec(
            num_scalar_prefetch=0,
            grid=(1,),  # whole batch in one step; split across this axis for large N (v7x megacore)
            in_specs=[
                pl.BlockSpec((n, c, hw), lambda i: (0, 0, 0)),
                pl.BlockSpec((kt, c), lambda i: (0, 0)),
                pl.BlockSpec((kt, 1), lambda i: (0, 0)),
            ],
            out_specs=[
                pl.BlockSpec((1, out_lanes), lambda i: (0, 0)),
                pl.BlockSpec((1, out_lanes), lambda i: (0, 0)),
            ],
            scratch_shapes=[pltpu.VMEM((k1, out_lanes), jnp.float32)],
        ),
        compiler_params=pltpu.CompilerParams(dimension_semantics=("parallel",)),
    )(x, w_all, b_all)

    scores = scores[0, : n * seq].reshape(n, seq)
    tokens = tokens[0, : n * seq].reshape(n, seq)
    return scores, tokens


def forward(inputs, params, cfg):
    feats = get_features(inputs, params, cfg)
    return scene_text_recognition_head(feats, params, cfg)


# ---------------------------------------------------------------------------
# Pure-JAX reference of the head (mirrors the kernel's bf16 MXU operands so the
# check is apples-to-apples; math is identical to the PyTorch forward).
# ---------------------------------------------------------------------------
def head_reference(feat, params, cfg):
    n, c, h, w = feat.shape
    hw = h * w
    x = feat.reshape(n, c, hw).astype(jnp.bfloat16)
    w_cls = params["class_head"]["w"][:, :, 0, 0].astype(jnp.bfloat16)   # (K1, C)
    w_idx = params["index_head"]["w"][:, :, 0, 0].astype(jnp.bfloat16)   # (L, C)
    b_cls = params["class_head"]["b"]
    b_idx = params["index_head"]["b"]
    cls = jnp.einsum("kc,nch->nkh", w_cls, x,
                     preferred_element_type=jnp.float32) + b_cls[None, :, None]
    idx = jax.nn.sigmoid(
        jnp.einsum("lc,nch->nlh", w_idx, x,
                   preferred_element_type=jnp.float32) + b_idx[None, :, None])
    logits = jnp.einsum("nkh,nlh->nkl", cls.astype(jnp.bfloat16), idx.astype(jnp.bfloat16),
                        preferred_element_type=jnp.float32) / hw
    ssq = jnp.sum(logits * logits, axis=1, keepdims=True)
    logits = logits * lax.rsqrt(jnp.maximum(ssq, 1e-24)) * cfg["logitnorm_scale"]
    probs = jax.nn.softmax(logits, axis=1)
    scores = probs.max(axis=1)
    tokens = probs.argmax(axis=1).astype(jnp.int32)
    pad = tokens == cfg["num_tokens"]
    return jnp.where(pad, 0.0, scores), jnp.where(pad, 0, tokens)


if __name__ == "__main__":
    cfg = dict(
        in_channels=[8, 8, 8, 16, 16, 32],
        num_tokens=12,
        max_sequence_length=8,
        bottom_level=3,
        top_level=5,
        num_channels=32,
        num_layers=2,
        pool_sizes=[1, 2],
        logitnorm_scale=20.0,
    )
    batch = 2
    base = 64  # level l feature map has spatial size base // 2**l

    key = jax.random.PRNGKey(0)
    pkey, xkey = jax.random.split(key)
    params = init_params(pkey, cfg)

    inputs = []
    for lvl, ch in enumerate(cfg["in_channels"]):
        s = base // (2 ** lvl)
        xkey, sub = jax.random.split(xkey)
        inputs.append(jax.random.normal(sub, (batch, ch, s, s), jnp.float32))

    feats = get_features(inputs, params, cfg)
    scores, tokens = scene_text_recognition_head(feats, params, cfg)
    scores = jax.block_until_ready(scores)
    tokens = jax.block_until_ready(tokens)

    ref_scores, ref_tokens = head_reference(feats, params, cfg)
    assert scores.shape == (batch, cfg["max_sequence_length"])
    assert tokens.shape == (batch, cfg["max_sequence_length"])
    assert np.allclose(np.asarray(scores), np.asarray(ref_scores), atol=1e-2), "scores mismatch"
    assert np.array_equal(np.asarray(tokens), np.asarray(ref_tokens)), "tokens mismatch"

    print("KERNEL_OK")
</pallas_src>

<mosaic_0001>
module attributes {stable_mosaic.version = 11 : i64} {
  func.func @head_kernel(%arg0: i32, %arg1: memref<2x32x64xbf16, #tpu.memory_space<vmem>>, %arg2: memref<21x32xbf16, #tpu.memory_space<vmem>>, %arg3: memref<21x1xf32, #tpu.memory_space<vmem>>, %arg4: memref<1x128xf32, #tpu.memory_space<vmem>>, %arg5: memref<1x128xi32, #tpu.memory_space<vmem>>, %arg6: memref<13x128xf32, #tpu.memory_space<vmem>>) attributes {dimension_semantics = [#tpu.dimension_semantics<parallel>], iteration_bounds = array<i64: 1>, scalar_prefetch = 0 : i64, scratch_operands = 1 : i64, tpu.core_type = #tpu.core_type<tc>, window_params = [{pipeline_mode = #tpu.pipeline_mode<synchronous>, transform_indices = @transform_0, window_bounds = array<i64: 2, 32, 64>}, {pipeline_mode = #tpu.pipeline_mode<synchronous>, transform_indices = @transform_1, window_bounds = array<i64: 21, 32>}, {pipeline_mode = #tpu.pipeline_mode<synchronous>, transform_indices = @transform_2, window_bounds = array<i64: 21, 1>}, {pipeline_mode = #tpu.pipeline_mode<synchronous>, transform_indices = @transform_3, window_bounds = array<i64: 1, 128>}, {pipeline_mode = #tpu.pipeline_mode<synchronous>, transform_indices = @transform_4, window_bounds = array<i64: 1, 128>}]} {
    %c0 = arith.constant 0 : index
    %c0_0 = arith.constant 0 : index
    %0 = vector.load %arg2[%c0, %c0_0] : memref<21x32xbf16, #tpu.memory_space<vmem>>, vector<21x32xbf16>
    %c0_1 = arith.constant 0 : index
    %c0_2 = arith.constant 0 : index
    %1 = vector.load %arg3[%c0_1, %c0_2] : memref<21x1xf32, #tpu.memory_space<vmem>>, vector<21x1xf32>
    %cst = arith.constant 0.000000e+00 : f32
    %2 = vector.broadcast %cst : f32 to vector<13x128xf32>
    %c0_3 = arith.constant 0 : index
    %c0_4 = arith.constant 0 : index
    %3 = vector.load %arg6[%c0_3, %c0_4] : memref<13x128xf32, #tpu.memory_space<vmem>>, vector<13x128xf32>
    tpu.vector_store %arg6[%c0_3, %c0_4], %2 {strides = array<i32>} : memref<13x128xf32, #tpu.memory_space<vmem>>, vector<13x128xf32>,
    %c0_5 = arith.constant 0 : index
    %c0_6 = arith.constant 0 : index
    %c0_7 = arith.constant 0 : index
    %4 = vector.load %arg1[%c0_5, %c0_6, %c0_7] : memref<2x32x64xbf16, #tpu.memory_space<vmem>>, vector<1x32x64xbf16>
    %5 = vector.shape_cast %4 : vector<1x32x64xbf16> to vector<32x64xbf16>
    %cst_8 = arith.constant dense<0.000000e+00> : vector<21x64xf32>
    %6 = tpu.matmul %0, %5, %cst_8 {dimension_numbers = #tpu.dot_dimension_numbers<[1], [0], [0], [1], [0, 0, 1, 1], [], []>} : vector<21x32xbf16>, vector<32x64xbf16>, vector<21x64xf32> -> vector<21x64xf32>
    %7 = vector.broadcast %1 : vector<21x1xf32> to vector<21x64xf32>
    %8 = arith.addf %6, %7 : vector<21x64xf32>
    %9 = vector.extract_strided_slice %8 {offsets = [0, 0], sizes = [13, 64], strides = [1, 1]} : vector<21x64xf32> to vector<13x64xf32>
    %10 = vector.extract_strided_slice %8 {offsets = [13, 0], sizes = [8, 64], strides = [1, 1]} : vector<21x64xf32> to vector<8x64xf32>
    %11 = arith.negf %10 : vector<8x64xf32>
    %12 = math.exp %11 : vector<8x64xf32>
    %cst_9 = arith.constant 1.000000e+00 : f32
    %13 = vector.broadcast %cst_9 : f32 to vector<8x64xf32>
    %14 = arith.addf %13, %12 : vector<8x64xf32>
    %15 = arith.divf %13, %14 : vector<8x64xf32>
    %16 = arith.truncf %9 : vector<13x64xf32> to vector<13x64xbf16>
    %17 = arith.truncf %15 : vector<8x64xf32> to vector<8x64xbf16>
    %cst_10 = arith.constant dense<0.000000e+00> : vector<13x8xf32>
    %18 = tpu.matmul %16, %17, %cst_10 {dimension_numbers = #tpu.dot_dimension_numbers<[1], [1], [0], [0], [0, 0, 1, 0], [], []>} : vector<13x64xbf16>, vector<8x64xbf16>, vector<13x8xf32> -> vector<13x8xf32>
    %cst_11 = arith.constant 1.562500e-02 : f32
    %19 = vector.broadcast %cst_11 : f32 to vector<13x8xf32>
    %20 = arith.mulf %18, %19 : vector<13x8xf32>
    %c0_12 = arith.constant 0 : index
    %c0_13 = arith.constant 0 : index
    %21 = vector.load %arg6[%c0_12, %c0_13] : memref<13x128xf32, #tpu.memory_space<vmem>>, vector<13x8xf32>
    tpu.vector_store %arg6[%c0_12, %c0_13], %20 {strides = array<i32>} : memref<13x128xf32, #tpu.memory_space<vmem>>, vector<13x8xf32>,
    %c1 = arith.constant 1 : index
    %c0_14 = arith.constant 0 : index
    %c0_15 = arith.constant 0 : index
    %22 = vector.load %arg1[%c1, %c0_14, %c0_15] : memref<2x32x64xbf16, #tpu.memory_space<vmem>>, vector<1x32x64xbf16>
    %23 = vector.shape_cast %22 : vector<1x32x64xbf16> to vector<32x64xbf16>
    %cst_16 = arith.constant dense<0.000000e+00> : vector<21x64xf32>
    %24 = tpu.matmul %0, %23, %cst_16 {dimension_numbers = #tpu.dot_dimension_numbers<[1], [0], [0], [1], [0, 0, 1, 1], [], []>} : vector<21x32xbf16>, vector<32x64xbf16>, vector<21x64xf32> -> vector<21x64xf32>
    %25 = vector.broadcast %1 : vector<21x1xf32> to vector<21x64xf32>
    %26 = arith.addf %24, %25 : vector<21x64xf32>
    %27 = vector.extract_strided_slice %26 {offsets = [0, 0], sizes = [13, 64], strides = [1, 1]} : vector<21x64xf32> to vector<13x64xf32>
    %28 = vector.extract_strided_slice %26 {offsets = [13, 0], sizes = [8, 64], strides = [1, 1]} : vector<21x64xf32> to vector<8x64xf32>
    %29 = arith.negf %28 : vector<8x64xf32>
    %30 = math.exp %29 : vector<8x64xf32>
    %cst_17 = arith.constant 1.000000e+00 : f32
    %31 = vector.broadcast %cst_17 : f32 to vector<8x64xf32>
    %32 = arith.addf %31, %30 : vector<8x64xf32>
    %33 = arith.divf %31, %32 : vector<8x64xf32>
    %34 = arith.truncf %27 : vector<13x64xf32> to vector<13x64xbf16>
    %35 = arith.truncf %33 : vector<8x64xf32> to vector<8x64xbf16>
    %cst_18 = arith.constant dense<0.000000e+00> : vector<13x8xf32>
    %36 = tpu.matmul %34, %35, %cst_18 {dimension_numbers = #tpu.dot_dimension_numbers<[1], [1], [0], [0], [0, 0, 1, 0], [], []>} : vector<13x64xbf16>, vector<8x64xbf16>, vector<13x8xf32> -> vector<13x8xf32>
    %cst_19 = arith.constant 1.562500e-02 : f32
    %37 = vector.broadcast %cst_19 : f32 to vector<13x8xf32>
    %38 = arith.mulf %36, %37 : vector<13x8xf32>
    %c0_20 = arith.constant 0 : index
    %c8 = arith.constant 8 : index
    %39 = vector.load %arg6[%c0_20, %c8] : memref<13x128xf32, #tpu.memory_space<vmem>>, vector<13x8xf32>
    tpu.vector_store %arg6[%c0_20, %c8], %38 {strides = array<i32>} : memref<13x128xf32, #tpu.memory_space<vmem>>, vector<13x8xf32>,
    %c0_21 = arith.constant 0 : index
    %c0_22 = arith.constant 0 : index
    %40 = vector.load %arg6[%c0_21, %c0_22] : memref<13x128xf32, #tpu.memory_space<vmem>>, vector<13x128xf32>
    %41 = arith.mulf %40, %40 : vector<13x128xf32>
    %cst_23 = arith.constant dense<0.000000e+00> : vector<128xf32>
    %42 = vector.multi_reduction <add>, %41, %cst_23 [0] : vector<13x128xf32> to vector<128xf32>
    %43 = vector.shape_cast %42 : vector<128xf32> to vector<1x128xf32>
    %cst_24 = arith.constant 1.000000e-24 : f32
    %44 = vector.broadcast %cst_24 : f32 to vector<1x128xf32>
    %45 = arith.maximumf %43, %44 : vector<1x128xf32>
    %46 = math.rsqrt %45 : vector<1x128xf32>
    %cst_25 = arith.constant 2.000000e+01 : f32
    %47 = vector.broadcast %cst_25 : f32 to vector<1x128xf32>
    %48 = arith.mulf %46, %47 : vector<1x128xf32>
    %49 = vector.broadcast %48 : vector<1x128xf32> to vector<13x128xf32>
    %50 = arith.mulf %40, %49 : vector<13x128xf32>
    %cst_26 = arith.constant dense<0xFF800000> : vector<128xf32>
    %51 = vector.multi_reduction <maximumf>, %50, %cst_26 [0] : vector<13x128xf32> to vector<128xf32>
    %52 = vector.shape_cast %51 : vector<128xf32> to vector<1x128xf32>
    %53 = vector.broadcast %52 : vector<1x128xf32> to vector<13x128xf32>
    %54 = arith.subf %50, %53 : vector<13x128xf32>
    %55 = math.exp %54 : vector<13x128xf32>
    %cst_27 = arith.constant dense<0.000000e+00> : vector<128xf32>
    %56 = vector.multi_reduction <add>, %55, %cst_27 [0] : vector<13x128xf32> to vector<128xf32>
    %57 = vector.shape_cast %56 : vector<128xf32> to vector<1x128xf32>
    %58 = tpu.reciprocal %57 {approx = true} : vector<1x128xf32> -> vector<1x128xf32>
    %59 = vector.broadcast %58 : vector<1x128xf32> to vector<13x128xf32>
    %60 = arith.mulf %55, %59 : vector<13x128xf32>
    %cst_28 = arith.constant dense<0xFF800000> : vector<128xf32>
    %61 = vector.multi_reduction <maximumf>, %60, %cst_28 [0] : vector<13x128xf32> to vector<128xf32>
    %62 = vector.shape_cast %61 : vector<128xf32> to vector<1x128xf32>
    %63 = tpu.iota {dimensions = array<i32: 0>} : vector<13x128xi32>
    %64 = vector.broadcast %62 : vector<1x128xf32> to vector<13x128xf32>
    %65 = arith.cmpf oeq, %60, %64 : vector<13x128xf32>
    %c13_i32 = arith.constant 13 : i32
    %66 = vector.broadcast %c13_i32 : i32 to vector<13x128xi32>
    %67 = arith.select %65, %63, %66 : vector<13x128xi1>, vector<13x128xi32>
    %cst_29 = arith.constant dense<2147483647> : vector<128xi32>
    %68 = vector.multi_reduction <minsi>, %67, %cst_29 [0] : vector<13x128xi32> to vector<128xi32>
    %69 = vector.shape_cast %68 : vector<128xi32> to vector<1x128xi32>
    %70 = tpu.iota {dimensions = array<i32: 1>} : vector<1x128xi32>
    %c16_i32 = arith.constant 16 : i32
    %71 = vector.broadcast %c16_i32 : i32 to vector<1x128xi32>
    %72 = arith.cmpi slt, %70, %71 : vector<1x128xi32>
    %c12_i32 = arith.constant 12 : i32
    %73 = vector.broadcast %c12_i32 : i32 to vector<1x128xi32>
    %74 = arith.cmpi ne, %69, %73 : vector<1x128xi32>
    %75 = arith.andi %72, %74 : vector<1x128xi1>
    %cst_30 = arith.constant 0.000000e+00 : f32
    %76 = vector.broadcast %cst_30 : f32 to vector<1x128xf32>
    %77 = arith.select %75, %62, %76 : vector<1x128xi1>, vector<1x128xf32>
    %c0_31 = arith.constant 0 : index
    %c0_32 = arith.constant 0 : index
    %78 = vector.load %arg4[%c0_31, %c0_32] : memref<1x128xf32, #tpu.memory_space<vmem>>, vector<1x128xf32>
    tpu.vector_store %arg4[%c0_31, %c0_32], %77 {strides = array<i32>} : memref<1x128xf32, #tpu.memory_space<vmem>>, vector<1x128xf32>,
    %c0_i32 = arith.constant 0 : i32
    %79 = vector.broadcast %c0_i32 : i32 to vector<1x128xi32>
    %80 = arith.select %75, %69, %79 : vector<1x128xi1>, vector<1x128xi32>
    %c0_33 = arith.constant 0 : index
    %c0_34 = arith.constant 0 : index
    %81 = vector.load %arg5[%c0_33, %c0_34] : memref<1x128xi32, #tpu.memory_space<vmem>>, vector<1x128xi32>
    tpu.vector_store %arg5[%c0_33, %c0_34], %80 {strides = array<i32>} : memref<1x128xi32, #tpu.memory_space<vmem>>, vector<1x128xi32>,
    return
  }
  func.func @transform_0(%arg0: i32) -> (i32, i32, i32) {
    %c0_i32 = arith.constant 0 : i32
    %c0_i32_0 = arith.constant 0 : i32
    %c0_i32_1 = arith.constant 0 : i32
    %c0_i32_2 = arith.constant 0 : i32
    return %c0_i32, %c0_i32_0, %c0_i32_1 : i32, i32, i32
  }
  func.func @transform_1(%arg0: i32) -> (i32, i32) {
    %c0_i32 = arith.constant 0 : i32
    %c0_i32_0 = arith.constant 0 : i32
    %c0_i32_1 = arith.constant 0 : i32
    return %c0_i32, %c0_i32_0 : i32, i32
  }
  func.func @transform_2(%arg0: i32) -> (i32, i32) {
    %c0_i32 = arith.constant 0 : i32
    %c0_i32_0 = arith.constant 0 : i32
    %c0_i32_1 = arith.constant 0 : i32
    return %c0_i32, %c0_i32_0 : i32, i32
  }
  func.func @transform_3(%arg0: i32) -> (i32, i32) {
    %c0_i32 = arith.constant 0 : i32
    %c0_i32_0 = arith.constant 0 : i32
    %c0_i32_1 = arith.constant 0 : i32
    return %c0_i32, %c0_i32_0 : i32, i32
  }
  func.func @transform_4(%arg0: i32) -> (i32, i32) {
    %c0_i32 = arith.constant 0 : i32
    %c0_i32_0 = arith.constant 0 : i32
    %c0_i32_1 = arith.constant 0 : i32
    return %c0_i32, %c0_i32_0 : i32, i32
  }
}

</mosaic_0001>

<bundles_post_ra>
// kernel: tpu_custom_call.1
= control target key start
LH: loop header
LB: loop body
LE: loop exit
PB: predicated region body
PF: predicated region fallthrough
CT: control target
= control target key end

     0   :  { %10 = vsyncpa [#allocation4], 0  ;;  %s659_s0 = inlined_call_operand.hbm [shape: bf16[2,32,64], index: 0, kind: input, shape index: {}]   ;;  %s660_s1 = inlined_call_operand.vmem [shape: bf16[21,32], index: 1, kind: input, shape index: {}]   ;;  %s661_s2 = inlined_call_operand.vmem [shape: f32[21,1], index: 2, kind: input, shape index: {}]   ;;  %s662_s3 = inlined_call_operand.hbm [shape: f32[1,128], index: 3, kind: output, shape index: {0}]   ;;  %s663_s4 = inlined_call_operand.hbm [shape: s32[1,128], index: 4, kind: output, shape index: {1}]  }
   0x1   :  { %11 = vsyncpa [#allocation5], 0 }
   0x2   :  { %12 = vsyncpa [#allocation8], 0  ;;  %s17_s17 = sshll.u32 %s659_s0, 4  ;;  %s567_s18 = smov [#allocation3]   ;;  %s18_s17 = int_to_ptr.hbm [resolvable:$true] %s17_s17 }
   0x3   :  { %s19_s19 = sshll.u32 %s567_s18, 4  ;;  %s568_s20 = smov 64   ;;  %s20_s19 = int_to_ptr.vmem [resolvable:$true] %s19_s19 }
   0x4   :  { %s569_s21 = smov 4  }
   0x5   :  { %25 = dma.hbm_to_vmem [thread:$0]  %s18_s17, 512, %s20_s19, [#allocation4], %s568_s20, %s568_s20, %s569_s21  }
   0x6   :  { %561 = dma.done.wait [#allocation4], 512  }
   0x7   :  { %562 = vsyncadd [#allocation4], 4294966784  ;;  %v570_v0 = vmov 0   ;;  %v452_v1 = vld [vmem:[#allocation3 + $0x8] sm:$0xff]  ;;  %v454_v2 = vld [vmem:[#allocation3 + $0x18] sm:$0xff]  ;;  %vm82_vm0 = vcmask 261120  }
   0x8   :  { %464 = vset.pattern.permute.xlu1 %v570_v0  ;;  %463 = vset.pattern.permute.xlu0 %v570_v0  ;;  %v451_v3 = vld [vmem:[#allocation3] sm:$0xff]  ;;  %v453_v4 = vld [vmem:[#allocation3 + $0x10] sm:$0xff]  ;;  %v39_v5 = vld [vmem:[%s661_s2 + $0x8] sm:$0xff]  ;;  %s394_s8 = sshll.u32 %s662_s3, 4  ;;  %s574_s9 = smov [#allocation7]   ;;  %s395_s8 = int_to_ptr.hbm [resolvable:$true] %s394_s8 }
   0x9   :  { %95 = vmatpush.bf16.msra.mxu0 %v452_v1  ;;  %205 = vmatpush.bf16.msra.mxu2 %v454_v2  ;;  %v38_v6 = vld [vmem:[%s661_s2] sm:$0xff]  ;;  %v40_v8 = vld [vmem:[%s661_s2 + $0x10] sm:$0x1f]  ;;  %v37_v9 = vld [vmem:[%s660_s1 + $0x8] sm:$0x7]  ;;  %s573_s2 = smov [#allocation6]  }
   0xa   :  { %54 = vperm.xlu0 %463, %v39_v5   ;;  %49 = vperm.xlu1 %464, %v38_v6   ;;  %v450_v7 = vld [vmem:[%s660_s1] sm:$0xff]  ;;  %v67_v10 = vunpack.c.l.b16 %v37_v9  ;;  %s572_s1 = smov 8   ;;  %s392_s5 = sshll.u32 %s573_s2, 4  ;;  %s393_s5 = int_to_ptr.vmem [resolvable:$true] %s392_s5 }
   0xb   :  { %s403_s10 = sshll.u32 %s574_s9, 4  ;;  %s405_s13 = sshll.u32 %s663_s4, 4  ;;  %s404_s10 = int_to_ptr.vmem [resolvable:$true] %s403_s10  ;;  %s406_s13 = int_to_ptr.hbm [resolvable:$true] %s405_s13 }
   0xc   :  { %v69_v11 = vpack.c.b16 %v67_v10, %v67_v10 }
   0xd   :  { %96 = vmatpush.bf16.msra.mxu0 %v451_v3  ;;  %206 = vmatpush.bf16.msra.mxu2 %v453_v4 }
  0x10   :  { %432 = vmatmul.msk.bf16.vlgmr.msra.gmra.mxu0 %vm82_vm0, %v450_v7  ;;  %445 = vmatmul.msk.bf16.vlgmr.msra.gmra.mxu2 %vm82_vm0, %v450_v7 }
  0x12   :  { %59 = vperm.xlu0 %463, %v40_v8  }
  0x20   :  { %433 = vmatmul.msk.bf16.gmra.mxu0 %vm82_vm0, %v69_v11  ;;  %446 = vmatmul.msk.bf16.gmra.mxu2 %vm82_vm0, %v69_v11 }
  0x7c   :  { %v55_v13 = vpop.permute.xlu0 %54 }
  0x84   :  { %v60_v20 = vpop.permute.xlu0 %59 }
  0x8d   :  { %v618_v12 = vpop.f32.mrf.mxu0 }
  0x93   :  { %v620_v14 = vpop.f32.mrf.mxu2 }
  0x95   :  { %v100_v15 = vpop.f32.mrf.mxu0 }
  0x96   :  { %v622_v16 = vadd.f32 %v100_v15, %v55_v13 }
  0x98   :  { %v434_v17 = vmul.f32 -1.442695, %v622_v16 }
  0x9a   :  { %465 = vpow2.f32 %v434_v17 }
  0x9b   :  { %v210_v18 = vpop.f32.mrf.mxu2 }
  0x9c   :  { %v625_v19 = vadd.f32 %v210_v18, %v55_v13 }
  0x9d   :  { %v103_v21 = vpop.f32.mrf.mxu0 }
  0x9e   :  { %v447_v22 = vmul.f32 -1.442695, %v625_v19  ;;  %v104_v23 = vadd.f32 %v103_v21, %v60_v20 }
  0xa0   :  { %v466_v24 = vpop.eup %465  ;;  %467 = vpow2.f32 %v447_v22  ;;  %v435_v25 = vmul.f32 -1.442695, %v104_v23 }
  0xa1   :  { %v113_v26 = vadd.f32 1.0, %v466_v24 }
  0xa2   :  { %469 = vpow2.f32 %v435_v25 }
  0xa3   :  { %471 = vrcp.f32 %v113_v26  ;;  %v213_v27 = vpop.f32.mrf.mxu2  ;;  %v124_v47 = vand.u32 2147483647, %v113_v26  ;;  %v126_v48 = vand.u32 2147483648, %v113_v26  ;;  %vm120_vm1 = vweird.f32 %v113_v26 }
  0xa4   :  { %v214_v28 = vadd.f32 %v213_v27, %v60_v20 }
  0xa5   :  { %v105_v29 = vpop.f32.mrf.mxu0  ;;  %vm125_vm5 = vcmp.eq.f32.partialorder %v124_v47, 8.507059e+37  ;;  %v127_v57 = vor.u32 1.1754944e-38, %v126_v48 }
  0xa6   :  { %v468_v30 = vpop.eup %467  ;;  %v448_v31 = vmul.f32 -1.442695, %v214_v28 }
  0xa7   :  { %v223_v32 = vadd.f32 1.0, %v468_v30  ;;  %v50_v30 = vpop.permute.xlu1 %49 }
  0xa8   :  { %v470_v33 = vpop.eup %469  ;;  %473 = vpow2.f32 %v448_v31  ;;  %v99_v31 = vadd.f32 %v618_v12, %v50_v30 }
  0xa9   :  { %v472_v34 = vpop.eup %471  ;;  %475 = vrcp.f32 %v223_v32  ;;  %v114_v35 = vadd.f32 1.0, %v470_v33  ;;  %vm230_vm9 = vweird.f32 %v223_v32  ;;  %v234_v62 = vand.u32 2147483647, %v223_v32 }
  0xaa   :  { %v116_v36 = vmul.f32 %v472_v34, %v113_v26  ;;  %vm121_vm2 = vweird.f32 %v472_v34  ;;  %v236_v4 = vand.u32 2147483648, %v223_v32 }
  0xab   :  { %477 = vrcp.f32 %v114_v35  ;;  %v215_v37 = vpop.f32.mrf.mxu2  ;;  %v139_v51 = vand.u32 2147483647, %v114_v35  ;;  %v141_v52 = vand.u32 2147483648, %v114_v35  ;;  %vm628_vm4 = vmor %vm120_vm1, %vm121_vm2  ;;  %vm135_vm6 = vweird.f32 %v114_v35 }
  0xac   :  { %v117_v38 = vsub.f32 1.0, %v116_v36  ;;  %vm235_vm14 = vcmp.eq.f32.partialorder %v234_v62, 8.507059e+37  ;;  %v237_v17 = vor.u32 1.1754944e-38, %v236_v4  ;;  %vm155_vm1 = vcmask 523264  }
  0xad   :  { %vm140_vm8 = vcmp.eq.f32.partialorder %v139_v51, 8.507059e+37  ;;  %v142_v61 = vor.u32 1.1754944e-38, %v141_v52  ;;  %v209_v37 = vadd.f32 %v620_v14, %v50_v30  ;;  %vm178_vm2 = vcmask 64512  }
  0xae   :  { %v474_v39 = vpop.eup %473  ;;  %v118_v43 = vmul.f32 %v472_v34, %v117_v38 }
  0xaf   :  { %v476_v40 = vpop.eup %475  ;;  %v224_v41 = vadd.f32 1.0, %v474_v39  ;;  %v255_v38 = vpack.c.bf16 %v625_v19, %v209_v37  ;;  %v571_v39 = vmov 0.0   ;;  %v359_v37 = vlaneseq }
  0xb0   :  { %v226_v42 = vmul.f32 %v476_v40, %v223_v32  ;;  %v119_v50 = vadd.f32 %v472_v34, %v118_v43  ;;  %vm231_vm10 = vweird.f32 %v476_v40  ;;  %41 = vst [vmem:[#allocation2] sm:$0xff] %v571_v39 }
  0xb1   :  { %v478_v44 = vpop.eup %477  ;;  %479 = vrcp.f32 %v224_v41  ;;  %v251_v5 = vand.u32 2147483648, %v224_v41  ;;  %v249_v8 = vand.u32 2147483647, %v224_v41  ;;  %vm634_vm12 = vmor %vm230_vm9, %vm231_vm10  ;;  %vm245_vm13 = vweird.f32 %v224_v41  ;;  %42 = vst [vmem:[#allocation2 + $0x8] sm:$0x1f] %v571_v39 }
  0xb2   :  { %v227_v45 = vsub.f32 1.0, %v226_v42  ;;  %v131_v46 = vmul.f32 %v478_v44, %v114_v35  ;;  %vm136_vm3 = vweird.f32 %v478_v44  ;;  %v123_v59 = vsel %vm628_vm4, %v472_v34, %v119_v50 }
  0xb3   :  { %vm137_vm7 = vmor %vm135_vm6, %vm136_vm3  ;;  %v128_v2 = vsel %vm125_vm5, %v127_v57, %v123_v59  ;;  %v252_v18 = vor.u32 1.1754944e-38, %v251_v5  ;;  %vm250_vm0 = vcmp.eq.f32.partialorder %v249_v8, 8.507059e+37  ;;  %v145_v35 = vpack.c.bf16 %v622_v16, %v99_v31 }
  0xb4   :  { %v132_v49 = vsub.f32 1.0, %v131_v46  ;;  %v228_v54 = vmul.f32 %v476_v40, %v227_v45  ;;  %vm180_vm3 = vcmask 61440   ;;  %vm295_vm4 = vcmask 130112  }
  0xb5   :  { %vm297_vm5 = vcmask 127040   ;;  %vm303_vm6 = vcmask 1044480  }
  0xb6   :  { %v133_v53 = vmul.f32 %v478_v44, %v132_v49  ;;  %v229_v1 = vadd.f32 %v476_v40, %v228_v54 }
  0xb7   :  { %v480_v55 = vpop.eup %479 }
  0xb8   :  { %v241_v58 = vmul.f32 %v480_v55, %v224_v41  ;;  %v134_v60 = vadd.f32 %v478_v44, %v133_v53  ;;  %vm246_vm11 = vweird.f32 %v480_v55  ;;  %v233_v13 = vsel %vm634_vm12, %v476_v40, %v229_v1 }
  0xb9   :  { %vm247_vm15 = vmor %vm245_vm13, %vm246_vm11  ;;  %v238_v23 = vsel %vm235_vm14, %v237_v17, %v233_v13 }
  0xba   :  { %v242_v63 = vsub.f32 1.0, %v241_v58  ;;  %v138_v0 = vsel %vm137_vm7, %v478_v44, %v134_v60 }
  0xbb   :  { %v143_v3 = vsel %vm140_vm8, %v142_v61, %v138_v0 }
  0xbc   :  { %v146_v6 = vpack.c.bf16 %v143_v3, %v128_v2  ;;  %v243_v7 = vmul.f32 %v480_v55, %v242_v63 }
  0xbe   :  { %v148_v10 = vshrl.u32 %v146_v6, 16  ;;  %v151_v11 = vshll.u32 %v146_v6, 16  ;;  %v244_v15 = vadd.f32 %v480_v55, %v243_v7 }
  0xc0   :  { %v150_v20 = vrot.slane %v148_v10, 2  ;;  %v153_v21 = vrot.slane %v151_v11, 3  ;;  %v248_v22 = vsel %vm247_vm15, %v480_v55, %v244_v15 }
  0xc1   :  { %v253_v24 = vsel %vm250_vm0, %v252_v18, %v248_v22 }
  0xc2   :  { %v154_v25 = vor.u32 %v153_v21, %v150_v20  ;;  %v256_v26 = vpack.c.bf16 %v253_v24, %v238_v23 }
  0xc4   :  { %v160_v27 = vsel %vm155_vm1, %v154_v25, 0  ;;  %v258_v28 = vshrl.u32 %v256_v26, 16  ;;  %v261_v29 = vshll.u32 %v256_v26, 16 }
  0xc5   :  { %169 = vmatpush.bf16.xpose.msra.mxu1 %v160_v27 }
  0xc6   :  { %v260_v32 = vrot.slane %v258_v28, 2  ;;  %v263_v33 = vrot.slane %v261_v29, 3 }
  0xc8   :  { %v264_v34 = vor.u32 %v263_v33, %v260_v32 }
  0xca   :  { %v269_v36 = vsel %vm155_vm1, %v264_v34, 0 }
  0xcb   :  { %278 = vmatpush.bf16.xpose.msra.mxu3 %v269_v36 }
  0xcc   :  { %436 = vmatmul.msk.bf16.vlgmr.msra.gmra.mxu1 %vm155_vm1, %v145_v35 }
  0xd2   :  { %449 = vmatmul.msk.bf16.vlgmr.msra.gmra.mxu3 %vm155_vm1, %v255_v38 }
 0x149   :  { %v171_v12 = vpop.f32.mrf.mxu1 }
 0x14a   :  { %v176_v40 = vmul.f32 0.015625, %v171_v12  ;;  %v360_v12 = vshrl.u32 %v359_v37, 7 }
 0x14c   :  { %179 = vst.msk [vmem:[#allocation2] sm:$0xff] %vm178_vm2, %v176_v40 }
 0x151   :  { %v173_v41 = vpop.f32.mrf.mxu1 }
 0x152   :  { %v177_v16 = vmul.f32 0.015625, %v173_v41 }
 0x154   :  { %181 = vst.msk [vmem:[#allocation2 + $0x8] sm:$0x1f] %vm180_vm3, %v177_v16  ;;  %v361_v16 = vadd.s32 8, %v360_v12 }
 0x155   :  { %v280_v42 = vpop.f32.mrf.mxu3 }
 0x156   :  { %v285_v43 = vmul.f32 0.015625, %v280_v42 }
 0x158   :  { %289 = vrot.lane.b32.xlu2 %v285_v43, %s572_s1 }
 0x15d   :  { %v282_v14 = vpop.f32.mrf.mxu3 }
 0x15e   :  { %v286_v44 = vmul.f32 0.015625, %v282_v14 }
 0x160   :  { %291 = vrot.lane.b32.xlu1 %v286_v44, %s572_s1 }
 0x1b2   :  { %v290_v19 = vpop.permute.xlu2 %289 }
 0x1b3   :  { %296 = vst.msk [vmem:[#allocation2] sm:$0xff] %vm295_vm4, %v290_v19 }
 0x1ba   :  { %v299_v46 = vld [vmem:[#allocation2] sm:$0xff] }
 0x1bb   :  { %v301_v49 = vmul.f32 %v299_v46, %v299_v46 }
 0x1d2   :  { %v292_v45 = vpop.permute.xlu1 %291 }
 0x1d3   :  { %298 = vst.msk [vmem:[#allocation2 + $0x8] sm:$0x1f] %vm297_vm5, %v292_v45 }
 0x1da   :  { %v300_v47 = vld [vmem:[#allocation2 + $0x8] sm:$0x1f] }
 0x1db   :  { %v302_v48 = vmul.f32 %v300_v47, %v300_v47 }
 0x1dd   :  { %v304_v50 = vsel %vm303_vm6, %v302_v48, 0.0  ;;  %v379_v48 = vand.u32 127, %v359_v37 }
 0x1de   :  { %v305_v51 = vadd.f32 %v304_v50, %v301_v49 }
 0x1df   :  { %vm380_vm0 = vcmp.lt.s32.totalorder %v379_v48, 16 }
 0x1e0   :  { %v306_v52 = vrot.slane %v305_v51, 4 }
 0x1e2   :  { %v307_v53 = vadd.f32 %v306_v52, %v305_v51 }
 0x1e4   :  { %v308_v54 = vrot.slane %v307_v53, 2 }
 0x1e6   :  { %v309_v55 = vadd.f32 %v308_v54, %v307_v53 }
 0x1e8   :  { %v310_v56 = vrot.slane %v309_v55, 1 }
 0x1ea   :  { %v311_v57 = vadd.f32 %v310_v56, %v309_v55 }
 0x1ec   :  { %v312_v58 = vmax.f32 %v311_v57, 1e-24 }
 0x1ee   :  { %481 = vrsqrt.f32 %v312_v58  ;;  %vm319_vm8 = vweird.f32 %v312_v58 }
 0x1f4   :  { %v482_v59 = vpop.eup %481 }
 0x1f5   :  { %v314_v60 = vmul.f32 %v482_v59, %v312_v58  ;;  %vm320_vm7 = vweird.f32 %v482_v59 }
 0x1f6   :  { %vm321_vm9 = vmor %vm319_vm8, %vm320_vm7 }
 0x1f7   :  { %v315_v61 = vmul.f32 %v482_v59, %v314_v60 }
 0x1f9   :  { %v316_v62 = vmul.f32 0.5, %v315_v61 }
 0x1fb   :  { %v317_v63 = vsub.f32 1.5, %v316_v62 }
 0x1fd   :  { %v318_v0 = vmul.f32 %v482_v59, %v317_v63 }
 0x1ff   :  { %v322_v1 = vsel %vm321_vm9, %v482_v59, %v318_v0 }
 0x200   :  { %v323_v2 = vmul.f32 20.0, %v322_v1 }
 0x202   :  { %v324_v3 = vmul.f32 %v323_v2, %v299_v46  ;;  %v325_v4 = vmul.f32 %v323_v2, %v300_v47 }
 0x204   :  { %v326_v5 = vsel %vm303_vm6, %v325_v4, -inf }
 0x205   :  { %v327_v6 = vmax.f32 %v324_v3, %v326_v5 }
 0x207   :  { %v328_v7 = vrot.slane %v327_v6, 4 }
 0x209   :  { %v329_v8 = vmax.f32 %v327_v6, %v328_v7 }
 0x20b   :  { %v330_v9 = vrot.slane %v329_v8, 2 }
 0x20d   :  { %v331_v10 = vmax.f32 %v329_v8, %v330_v9 }
 0x20f   :  { %v332_v11 = vrot.slane %v331_v10, 1 }
 0x211   :  { %v333_v13 = vmax.f32 %v331_v10, %v332_v11 }
 0x213   :  { %v334_v15 = vsub.f32 %v324_v3, %v333_v13  ;;  %v335_v17 = vsub.f32 %v325_v4, %v333_v13 }
 0x215   :  { %v336_v18 = vmul.f32 1.442695, %v334_v15  ;;  %v338_v20 = vmul.f32 1.442695, %v335_v17 }
 0x217   :  { %483 = vpow2.f32 %v336_v18 }
 0x218   :  { %485 = vpow2.f32 %v338_v20 }
 0x21d   :  { %v484_v21 = vpop.eup %483 }
 0x21e   :  { %v486_v22 = vpop.eup %485 }
 0x21f   :  { %v340_v23 = vsel %vm303_vm6, %v486_v22, 0.0 }
 0x220   :  { %v341_v24 = vadd.f32 %v484_v21, %v340_v23 }
 0x222   :  { %v342_v25 = vrot.slane %v341_v24, 4 }
 0x224   :  { %v343_v26 = vadd.f32 %v342_v25, %v341_v24 }
 0x226   :  { %v344_v27 = vrot.slane %v343_v26, 2 }
 0x228   :  { %v345_v28 = vadd.f32 %v344_v27, %v343_v26 }
 0x22a   :  { %v346_v29 = vrot.slane %v345_v28, 1 }
 0x22c   :  { %v347_v30 = vadd.f32 %v346_v29, %v345_v28 }
 0x22e   :  { %487 = vrcp.f32 %v347_v30 }
 0x234   :  { %v488_v31 = vpop.eup %487 }
 0x235   :  { %v349_v32 = vmul.f32 %v488_v31, %v484_v21  ;;  %v350_v33 = vmul.f32 %v488_v31, %v486_v22 }
 0x237   :  { %v351_v34 = vsel %vm303_vm6, %v350_v33, -inf }
 0x238   :  { %v352_v35 = vmax.f32 %v349_v32, %v351_v34 }
 0x23a   :  { %v353_v36 = vrot.slane %v352_v35, 4 }
 0x23c   :  { %v354_v38 = vmax.f32 %v352_v35, %v353_v36 }
 0x23e   :  { %v355_v39 = vrot.slane %v354_v38, 2 }
 0x240   :  { %v356_v40 = vmax.f32 %v354_v38, %v355_v39 }
 0x242   :  { %v357_v41 = vrot.slane %v356_v40, 1 }
 0x244   :  { %v358_v42 = vmax.f32 %v356_v40, %v357_v41 }
 0x246   :  { %vm362_vm10 = vcmp.eq.f32.partialorder %v349_v32, %v358_v42  ;;  %vm363_vm11 = vcmp.eq.f32.partialorder %v350_v33, %v358_v42 }
 0x247   :  { %v364_v43 = vsel %vm362_vm10, %v360_v12, 13  ;;  %v365_v14 = vsel %vm363_vm11, %v361_v16, 13 }
 0x248   :  { %v366_v44 = vsel %vm303_vm6, %v365_v14, 2147483647 }
 0x249   :  { %vm367_vm12 = vcmp.lt.s32.totalorder %v364_v43, %v366_v44 }
 0x24a   :  { %v368_v19 = vsel %vm367_vm12, %v364_v43, %v366_v44 }
 0x24b   :  { %v369_v45 = vrot.slane %v368_v19, 4 }
 0x24d   :  { %vm370_vm13 = vcmp.lt.s32.totalorder %v368_v19, %v369_v45 }
 0x24e   :  { %v371_v46 = vsel %vm370_vm13, %v368_v19, %v369_v45 }
 0x24f   :  { %v372_v47 = vrot.slane %v371_v46, 2 }
 0x251   :  { %vm373_vm14 = vcmp.lt.s32.totalorder %v371_v46, %v372_v47 }
 0x252   :  { %v374_v49 = vsel %vm373_vm14, %v371_v46, %v372_v47 }
 0x253   :  { %v375_v50 = vrot.slane %v374_v49, 1 }
 0x255   :  { %vm376_vm15 = vcmp.lt.s32.totalorder %v374_v49, %v375_v50 }
 0x256   :  { %v377_v51 = vsel %vm376_vm15, %v374_v49, %v375_v50 }
 0x257   :  { %vm381_vm1 = vcmp.ne.s32.totalorder %v377_v51, 12 }
 0x258   :  { %vm382_vm2 = vmand %vm380_vm0, %vm381_vm1 }
 0x259   :  { %v383_v52 = vsel %vm382_vm2, %v358_v42, 0.0  ;;  %v385_v53 = vsel %vm382_vm2, %v377_v51, 0 }
 0x25a   :  { %384 = vst [vmem:[#allocation6] sm:$0x1] %v383_v52 }
 0x25b   :  { %397 = dma.vmem_to_hbm [thread:$0]  %s393_s5, 16, %s395_s8, [#allocation5]   ;;  %386 = vst [vmem:[#allocation7] sm:$0x1] %v385_v53 }
 0x25c   :  { %408 = dma.vmem_to_hbm [thread:$0]  %s404_s10, 16, %s406_s13, [#allocation8]  }
 0x25d   :  { %563 = dma.done.wait [#allocation5], 16  }
 0x25e   :  { %564 = vsyncadd [#allocation5], 4294967280 }
 0x25f   :  { %565 = dma.done.wait [#allocation8], 16  }
 0x260   :  { %566 = vsyncadd [#allocation8], 4294967280 }
 0x261   :  { %417 = vsyncpa [#allocation4], 1 }
 0x262   :  { %418 = vsyncpa [#allocation5], 1 }
 0x263   :  { %419 = vsyncpa [#allocation8], 1 }

</bundles_post_ra>
